<compile_context>
chip_gen: v6e
topology: v6e:2x2x1
jax: 0.10.0
libtpu: 0.0.40
codegen_flags: <defaults>
</compile_context>

<pallas_src>
import functools

import numpy as np
import jax
import jax.numpy as jnp
from jax.experimental import pallas as pl
from jax.experimental.pallas import tpu as pltpu

LANE = 128  # lane-dense width for reduction outputs (unmasked stores)


def _round_up(a, b):
    return (a + b - 1) // b * b


# ---------------------------------------------------------------------------
# Packed weight-slab layout (one slab per net)
#   rows [0, r1)            : fused layer-1 weight [W1a ; W1b ; W1t ; 0]   width H
#   rows [r_bias, r_bias+8) : row 0 b1, row 1 b2, row 2 [bs|bt|bf], row 3 lambdas
#   rows [r_w2, r_w2+H)     : W2                                           width H
#   rows [r_w3, r_w3+H)     : fused heads [Ws | Wt | Wf]                   width 3D
# ---------------------------------------------------------------------------
def _slab_layout(D, H):
    in_w = 2 * D + 2                       # [a | b | t] layer-1 input width
    r1 = _round_up(in_w, 8)                # sublane-aligned K dim (zero rows)
    head_w = 3 * D                         # [S | T | F] fused head width
    cols = max(r1, H, head_w)
    r_bias = r1
    r_w2 = r_bias + 8
    r_w3 = r_w2 + _round_up(H, 8)
    n_rows = r_w3 + _round_up(H, 8)
    return dict(in_w=in_w, r1=r1, head_w=head_w, cols=cols,
                r_bias=r_bias, r_w2=r_w2, r_w3=r_w3, n_rows=n_rows)


def pack_net_params(key, D, H, factor, scale=0.1):
    """Deterministic canonical L2HMC S/T/Q net, packed into one f32 slab."""
    lay = _slab_layout(D, H)
    ks = jax.random.split(key, 7)
    W1a = np.asarray(jax.random.normal(ks[0], (D, H), jnp.float32)) * scale
    W1b = np.asarray(jax.random.normal(ks[1], (D, H), jnp.float32)) * scale
    W1t = np.asarray(jax.random.normal(ks[2], (2, H), jnp.float32)) * scale
    W2 = np.asarray(jax.random.normal(ks[3], (H, H), jnp.float32)) * scale
    Ws = np.asarray(jax.random.normal(ks[4], (H, D), jnp.float32)) * scale
    Wt = np.asarray(jax.random.normal(ks[5], (H, D), jnp.float32)) * scale
    Wf = np.asarray(jax.random.normal(ks[6], (H, D), jnp.float32)) * scale

    slab = np.zeros((lay["n_rows"], lay["cols"]), np.float32)
    # fused layer-1 weight
    slab[0:D, 0:H] = W1a
    slab[D:2 * D, 0:H] = W1b
    slab[2 * D:2 * D + 2, 0:H] = W1t
    # bias / lambda block (biases initialized to zero -> rows already zero)
    rb = lay["r_bias"]
    slab[rb + 3, 0:D] = factor              # lambda_s = factor * exp(0)
    slab[rb + 3, D:2 * D] = 1.0             # unused (T head has no tanh)
    slab[rb + 3, 2 * D:3 * D] = factor      # lambda_f = factor * exp(0)
    # second layer
    slab[lay["r_w2"]:lay["r_w2"] + H, 0:H] = W2
    # fused heads
    slab[lay["r_w3"]:lay["r_w3"] + H, 0:D] = Ws
    slab[lay["r_w3"]:lay["r_w3"] + H, D:2 * D] = Wt
    slab[lay["r_w3"]:lay["r_w3"] + H, 2 * D:3 * D] = Wf
    return jnp.asarray(slab), lay


# ---------------------------------------------------------------------------
# In-kernel fused MLP: 3 matmuls instead of 6, weights from one VMEM slab
# ---------------------------------------------------------------------------
def _mlp_fused(a, b, tpad, w_ref, *, D, H, lay):
    r1, hw = lay["r1"], lay["head_w"]
    rb, rw2, rw3 = lay["r_bias"], lay["r_w2"], lay["r_w3"]

    inp = jnp.concatenate([a, b, tpad], axis=1)              # (B, r1)
    b1 = w_ref[rb:rb + 1, 0:H]
    b2 = w_ref[rb + 1:rb + 2, 0:H]
    b3 = w_ref[rb + 2:rb + 3, 0:hw]
    lam = w_ref[rb + 3:rb + 4, 0:hw]

    h1 = jnp.maximum(
        jnp.dot(inp, w_ref[0:r1, 0:H], preferred_element_type=jnp.float32) + b1,
        0.0)
    h2 = jnp.maximum(
        jnp.dot(h1, w_ref[rw2:rw2 + H, 0:H],
                preferred_element_type=jnp.float32) + b2,
        0.0)
    head = jnp.dot(h2, w_ref[rw3:rw3 + H, 0:hw],
                   preferred_element_type=jnp.float32) + b3

    S = lam[:, 0:D] * jnp.tanh(head[:, 0:D])
    T = head[:, D:2 * D]
    F = lam[:, 2 * D:3 * D] * jnp.tanh(head[:, 2 * D:3 * D])
    return S, T, F


# ---------------------------------------------------------------------------
# Pallas kernels
# ---------------------------------------------------------------------------
def _make_step_a_kernel(D, H, lay):
    mlp = functools.partial(_mlp_fused, D=D, H=H, lay=lay)

    def kernel(eps_ref, x_ref, v_ref, g1_ref, t_ref, m_ref, mb_ref,
               vnet_ref, xnet_ref, xo_ref, vh_ref, part_ref):
        # First half of Dynamics._forward_step: v half-kick + two masked x updates.
        eps = eps_ref[0, 0]
        x = x_ref[...]
        v = v_ref[...]
        g1 = g1_ref[...]
        tp = t_ref[...]
        m = m_ref[...]
        mb = mb_ref[...]

        # VNet([x, grad1, t])
        S1, T1, F1 = mlp(x, g1, tp, vnet_ref)
        sv1 = (0.5 * eps) * S1
        v_h = v * jnp.exp(sv1) - (0.5 * eps) * (jnp.exp(eps * F1) * g1 + T1)

        # XNet([v_h, m*x, t])
        mx = m * x
        Sx1, Tx1, Fx1 = mlp(v_h, mx, tp, xnet_ref)
        sx1 = eps * Sx1
        y = mx + mb * (x * jnp.exp(sx1) + eps * (jnp.exp(eps * Fx1) * v_h + Tx1))

        # XNet([v_h, mb*y, t])
        mby = mb * y
        Sx2, Tx2, Fx2 = mlp(v_h, mby, tp, xnet_ref)
        sx2 = eps * Sx2
        x_o = mby + m * (y * jnp.exp(sx2) + eps * (jnp.exp(eps * Fx2) * v_h + Tx2))

        xo_ref[...] = x_o
        vh_ref[...] = v_h
        part = jnp.sum(sv1 + mb * sx1 + m * sx2, axis=1, keepdims=True)
        part_ref[...] = jnp.broadcast_to(part, part_ref.shape)   # lane-dense store

    return kernel


def _make_step_b_kernel(D, H, lay):
    mlp = functools.partial(_mlp_fused, D=D, H=H, lay=lay)

    def kernel(eps_ref, xo_ref, vh_ref, g2_ref, t_ref, part_ref, vnet_ref,
               vo_ref, logj_ref):
        # Second half of Dynamics._forward_step: v half-kick with grad(x_o) + log-jac.
        eps = eps_ref[0, 0]
        x_o = xo_ref[...]
        v_h = vh_ref[...]
        g2 = g2_ref[...]
        tp = t_ref[...]

        # VNet([x_o, grad2, t])
        S2, T2, F2 = mlp(x_o, g2, tp, vnet_ref)
        sv2 = (0.5 * eps) * S2
        v_o = v_h * jnp.exp(sv2) + (0.5 * eps) * (-(jnp.exp(eps * F2) * g2) + T2)

        vo_ref[...] = v_o
        logj = jnp.sum(sv2, axis=1, keepdims=True)
        logj_ref[...] = part_ref[...] + jnp.broadcast_to(logj, logj_ref.shape)

    return kernel


def _accept_kernel(invdut_ref, x0_ref, v0_ref, x1_ref, v1_ref,
                   ld0_ref, ld1_ref, j_ref, p_ref):
    # Dynamics.p_accept (quadratic part of the hamiltonian + MH acceptance).
    inv_dut = invdut_ref[0, 0]
    e_old = (0.5 * jnp.sum(v0_ref[...] ** 2, axis=1, keepdims=True)
             + 0.5 * jnp.sum(x0_ref[...] ** 2, axis=1, keepdims=True) * inv_dut
             - ld0_ref[...])
    e_new = (0.5 * jnp.sum(v1_ref[...] ** 2, axis=1, keepdims=True)
             + 0.5 * jnp.sum(x1_ref[...] ** 2, axis=1, keepdims=True) * inv_dut
             - ld1_ref[...])
    diff_h = e_old - e_new + j_ref[...]            # (B,1) broadcasts vs (B,LANE)
    p = jnp.minimum(jnp.exp(diff_h), 1.0)
    # torch.where(isfinite(p), p, 0):  abs(p) < inf rejects both inf and nan.
    p_ref[...] = jnp.where(jnp.abs(p) < np.float32(np.inf), p, jnp.zeros_like(p))


# ---------------------------------------------------------------------------
# pallas_call builders (grid-less: whole problem fits a single VMEM block;
# for large batch, add a batch grid with dimension_semantics=("parallel",)
# so v7x's 2 TensorCores both participate).
# ---------------------------------------------------------------------------
def _vmem():
    return pl.BlockSpec(memory_space=pltpu.MemorySpace.VMEM)


def _smem():
    return pl.BlockSpec(memory_space=pltpu.MemorySpace.SMEM)


def build_step_a(B, D, H, lay):
    return pl.pallas_call(
        _make_step_a_kernel(D, H, lay),
        out_shape=(jax.ShapeDtypeStruct((B, D), jnp.float32),
                   jax.ShapeDtypeStruct((B, D), jnp.float32),
                   jax.ShapeDtypeStruct((B, LANE), jnp.float32)),
        in_specs=[_smem()] + [_vmem()] * 8,
        out_specs=(_vmem(), _vmem(), _vmem()),
    )


def build_step_b(B, D, H, lay):
    return pl.pallas_call(
        _make_step_b_kernel(D, H, lay),
        out_shape=(jax.ShapeDtypeStruct((B, D), jnp.float32),
                   jax.ShapeDtypeStruct((B, LANE), jnp.float32)),
        in_specs=[_smem()] + [_vmem()] * 6,
        out_specs=(_vmem(), _vmem()),
    )


def build_accept(B):
    return pl.pallas_call(
        _accept_kernel,
        out_shape=jax.ShapeDtypeStruct((B, LANE), jnp.float32),
        in_specs=[_smem()] + [_vmem()] * 7,
        out_specs=_vmem(),
    )


# ---------------------------------------------------------------------------
# Dynamics module (Pallas-backed)
# ---------------------------------------------------------------------------
class Dynamics:
    def __init__(self, x_dim, deltaU, expk, Nt, T=4, eps=0.1, n_samples=2,
                 hidden=16):
        self.x_dim = x_dim
        self.Nt = Nt
        self.deltaU = float(deltaU)
        self.expk = np.asarray(expk)
        self.n_samples = n_samples
        self.T = T
        self.Temp = 1.0                                    # use_temperature=False
        self.alpha = float(np.log(np.float32(eps)))        # trainable log step size
        self.M = np.eye(x_dim, dtype=np.complex128)        # shared fermion matrix

        # _init_mask: random half-on masks per step.
        mask_per_step = []
        for _ in range(T):
            ind = np.random.permutation(np.arange(x_dim))[: x_dim // 2]
            m = np.zeros((x_dim,), dtype=np.float32)
            m[ind] = 1.0
            mask_per_step.append(m)
        self.mask = np.stack(mask_per_step).astype(np.float32)

        # Packed-per-net weight slabs (XNet factor=2.0, VNet factor=1.0).
        kx, kv = jax.random.split(jax.random.PRNGKey(1234))
        self.xnet_slab, self._lay = pack_net_params(kx, x_dim, hidden, factor=2.0)
        self.vnet_slab, _ = pack_net_params(kv, x_dim, hidden, factor=1.0)

        self._step_a = build_step_a(n_samples, x_dim, hidden, self._lay)
        self._step_b = build_step_b(n_samples, x_dim, hidden, self._lay)
        self._accept = build_accept(n_samples)

        self._eps_arr = jnp.full((1, 1), np.exp(self.alpha), dtype=jnp.float32)
        self._invdut = jnp.full((1, 1), 1.0 / (self.deltaU * self.Temp),
                                dtype=jnp.float32)

        # Precompute per-step device tensors: padded time vectors and masks.
        tw = self._lay["r1"] - 2 * x_dim
        self._tvecs_dev = []
        self._masks_dev = []
        for step in range(T):
            tv = np.zeros((n_samples, tw), np.float32)
            tv[:, 0] = np.cos(2 * np.pi * step / T)
            tv[:, 1] = np.sin(2 * np.pi * step / T)
            self._tvecs_dev.append(jnp.asarray(tv))
            mrow = np.tile(self.mask[step][None, :], (n_samples, 1))
            self._masks_dev.append((jnp.asarray(mrow),
                                    jnp.asarray(1.0 - mrow)))

    # -------- host-side complex fermion-matrix machinery (as in reference) ---
    # TODO(synk): complex linear algebra (Mphi / calcTrMM / calcLogDetMM) has
    # no Pallas/TPU lowering; kept in numpy, mirroring the reference which
    # already detaches to numpy for these routines.
    def Mphi(self, x_np):
        n = x_np.shape[1]
        nx = n // self.Nt
        nt = self.Nt
        for i in range(x_np.shape[0]):
            x_i = x_np[i]
            Mi = self.M_all[i]   # all entries alias self.M (aliasing as in reference)
            for t in range(nt - 1):
                for x1 in range(nx):
                    Mi[t * nx + x1, t * nx + x1] = 1.0
                    for y in range(nx):
                        Mi[(t + 1) * nx + x1, t * nx + y] = \
                            -self.expk[x1, y] * np.exp(1j * x_i[t * nx + y])
            for x1 in range(nx):
                Mi[(nt - 1) * nx + x1, (nt - 1) * nx + x1] = 1.0
                for y in range(nx):
                    Mi[x1, (nt - 1) * nx + y] = \
                        self.expk[x1, y] * np.exp(1j * x_i[(nt - 1) * nx + y])
        return 0

    def calcLogDetMM(self, x_np):
        self.Mphi(x_np)
        det_MM = np.array([np.log(np.linalg.det(self.M_all[i]))
                           for i in range(x_np.shape[0])])
        self.Mphi(-x_np)
        det_MM = det_MM + np.array([np.log(np.linalg.det(self.M_all[i]))
                                    for i in range(x_np.shape[0])])
        return det_MM

    def calcTrMM(self, x_np, sign):
        n = x_np.shape[1]
        nx = n // self.Nt
        nt = self.Nt
        self.Mphi(x_np)
        invM = np.array([np.linalg.inv(self.M_all[i])
                         for i in range(x_np.shape[0])])
        TrMM = []
        for i in range(x_np.shape[0]):
            x_i = x_np[i]
            TrMM_i = []
            for t in range(nt - 1):
                for x1 in range(nx):
                    temp = 0 + 0j
                    for y in range(nx):
                        temp += invM[i][t * nx + x1][(t + 1) * nx + y] * self.expk[y][x1]
                    TrMM_i.append(temp * (-sign * 1j * np.exp(1j * x_i[t * nx + x1])))
            for x1 in range(nx):
                temp = 0 + 0j
                for y in range(nx):
                    temp += invM[i][(nt - 1) * nx + x1][y] * self.expk[y][x1]
                TrMM_i.append(temp * sign * 1j * np.exp(1j * x_i[(nt - 1) * nx + x1]))
            TrMM.append(np.array(TrMM_i))
        return np.array(TrMM)

    def grad_energy(self, x):
        x_np = np.asarray(jax.device_get(x), dtype=np.float32)
        c = np.real(self.calcTrMM(x_np, 1))
        return jnp.asarray(x_np / self.deltaU - 2.0 * c, dtype=jnp.float32)

    # ---------------------------- acceptance ---------------------------------
    def p_accept(self, x0, v0, x1, v1, log_jac):
        ld_old = np.real(self.calcLogDetMM(
            np.asarray(jax.device_get(x0), dtype=np.float32)))
        ld_new = np.real(self.calcLogDetMM(
            np.asarray(jax.device_get(x1), dtype=np.float32)))
        p = self._accept(self._invdut, x0, v0, x1, v1,
                         jnp.asarray(ld_old[:, None], dtype=jnp.float32),
                         jnp.asarray(ld_new[:, None], dtype=jnp.float32),
                         log_jac)
        return p[:, 0]

    # ---------------------------- forward ------------------------------------
    def forward(self, x, init_v=None, aux=None, return_log_jac=False):
        self.M_all = [self.M for _ in range(self.n_samples)]   # aliasing as in reference
        if init_v is None:
            v = jax.random.normal(jax.random.PRNGKey(0),
                                  (self.n_samples, self.x_dim), jnp.float32)
        else:
            v = jnp.asarray(init_v, dtype=jnp.float32)
        x = jnp.asarray(x, dtype=jnp.float32)
        B = x.shape[0]
        assert B == self.n_samples, "batch must equal n_samples"
        j = jnp.zeros((B, LANE), jnp.float32)
        x_init, v_init = x, v

        for step in range(self.T):
            tvec = self._tvecs_dev[step]
            m_b, mb_b = self._masks_dev[step]
            grad1 = self.grad_energy(x)                 # host round-trip (complex linalg)
            x_o, v_h, part = self._step_a(self._eps_arr, x, v, grad1, tvec,
                                          m_b, mb_b,
                                          self.vnet_slab, self.xnet_slab)
            grad2 = self.grad_energy(x_o)               # host round-trip (complex linalg)
            v, logj = self._step_b(self._eps_arr, x_o, v_h, grad2, tvec, part,
                                   self.vnet_slab)
            x = x_o
            j = j + logj

        if return_log_jac:
            return x, v, j[:, 0]
        return x, v, self.p_accept(x_init, v_init, x, v, j), j[:, 0]


# ---------------------------------------------------------------------------
if __name__ == "__main__":
    np.random.seed(0)
    key = jax.random.PRNGKey(0)

    Nt, nx = 4, 2
    x_dim = Nt * nx          # 8
    batch = 2
    kappa = 0.1
    expk = np.array([[np.cosh(kappa), np.sinh(kappa)],
                     [np.sinh(kappa), np.cosh(kappa)]], dtype=np.float64)

    dyn = Dynamics(x_dim=x_dim, deltaU=2.0, expk=expk, Nt=Nt,
                   T=4, eps=0.1, n_samples=batch, hidden=16)

    kx, kv = jax.random.split(key)
    x = jax.random.normal(kx, (batch, x_dim), jnp.float32) * 0.5
    init_v = jax.random.normal(kv, (batch, x_dim), jnp.float32)

    x_out, v_out, p_acc, log_jac = dyn.forward(x, init_v=init_v)
    jax.block_until_ready((x_out, v_out, p_acc, log_jac))

    assert x_out.shape == (batch, x_dim) and v_out.shape == (batch, x_dim)
    assert p_acc.shape == (batch,) and log_jac.shape == (batch,)
    assert bool(jnp.all(jnp.isfinite(x_out))) and bool(jnp.all(jnp.isfinite(v_out)))
    print("KERNEL_OK")
</pallas_src>

<mosaic_0001>
module attributes {stable_mosaic.version = 11 : i64} {
  func.func @kernel(%arg0: memref<1x1xf32, #tpu.memory_space<smem>>, %arg1: memref<2x8xf32, #tpu.memory_space<vmem>>, %arg2: memref<2x8xf32, #tpu.memory_space<vmem>>, %arg3: memref<2x8xf32, #tpu.memory_space<vmem>>, %arg4: memref<2x8xf32, #tpu.memory_space<vmem>>, %arg5: memref<2x8xf32, #tpu.memory_space<vmem>>, %arg6: memref<2x8xf32, #tpu.memory_space<vmem>>, %arg7: memref<64x24xf32, #tpu.memory_space<vmem>>, %arg8: memref<64x24xf32, #tpu.memory_space<vmem>>, %arg9: memref<2x8xf32, #tpu.memory_space<vmem>>, %arg10: memref<2x8xf32, #tpu.memory_space<vmem>>, %arg11: memref<2x128xf32, #tpu.memory_space<vmem>>) attributes {dimension_semantics = [], scalar_prefetch = 0 : i64, scratch_operands = 0 : i64, tpu.core_type = #tpu.core_type<tc>} {
    %c0 = arith.constant 0 : index
    %c0_0 = arith.constant 0 : index
    %0 = memref.load %arg0[%c0, %c0_0] : memref<1x1xf32, #tpu.memory_space<smem>>
    %c0_1 = arith.constant 0 : index
    %c0_2 = arith.constant 0 : index
    %1 = vector.load %arg1[%c0_1, %c0_2] : memref<2x8xf32, #tpu.memory_space<vmem>>, vector<2x8xf32>
    %c0_3 = arith.constant 0 : index
    %c0_4 = arith.constant 0 : index
    %2 = vector.load %arg2[%c0_3, %c0_4] : memref<2x8xf32, #tpu.memory_space<vmem>>, vector<2x8xf32>
    %c0_5 = arith.constant 0 : index
    %c0_6 = arith.constant 0 : index
    %3 = vector.load %arg3[%c0_5, %c0_6] : memref<2x8xf32, #tpu.memory_space<vmem>>, vector<2x8xf32>
    %c0_7 = arith.constant 0 : index
    %c0_8 = arith.constant 0 : index
    %4 = vector.load %arg4[%c0_7, %c0_8] : memref<2x8xf32, #tpu.memory_space<vmem>>, vector<2x8xf32>
    %c0_9 = arith.constant 0 : index
    %c0_10 = arith.constant 0 : index
    %5 = vector.load %arg5[%c0_9, %c0_10] : memref<2x8xf32, #tpu.memory_space<vmem>>, vector<2x8xf32>
    %c0_11 = arith.constant 0 : index
    %c0_12 = arith.constant 0 : index
    %6 = vector.load %arg6[%c0_11, %c0_12] : memref<2x8xf32, #tpu.memory_space<vmem>>, vector<2x8xf32>
    %7 = tpu.concatenate %1, %3, %4 in 1 : vector<2x8xf32>, vector<2x8xf32>, vector<2x8xf32> -> vector<2x24xf32>
    %c24 = arith.constant 24 : index
    %c0_13 = arith.constant 0 : index
    %8 = vector.load %arg7[%c24, %c0_13] : memref<64x24xf32, #tpu.memory_space<vmem>>, vector<1x16xf32>
    %c25 = arith.constant 25 : index
    %c0_14 = arith.constant 0 : index
    %9 = vector.load %arg7[%c25, %c0_14] : memref<64x24xf32, #tpu.memory_space<vmem>>, vector<1x16xf32>
    %c26 = arith.constant 26 : index
    %c0_15 = arith.constant 0 : index
    %10 = vector.load %arg7[%c26, %c0_15] : memref<64x24xf32, #tpu.memory_space<vmem>>, vector<1x24xf32>
    %c27 = arith.constant 27 : index
    %c0_16 = arith.constant 0 : index
    %11 = vector.load %arg7[%c27, %c0_16] : memref<64x24xf32, #tpu.memory_space<vmem>>, vector<1x24xf32>
    %c0_17 = arith.constant 0 : index
    %c0_18 = arith.constant 0 : index
    %12 = vector.load %arg7[%c0_17, %c0_18] : memref<64x24xf32, #tpu.memory_space<vmem>>, vector<24x16xf32>
    %cst = arith.constant dense<0.000000e+00> : vector<2x16xf32>
    %13 = tpu.matmul %7, %12, %cst {dimension_numbers = #tpu.dot_dimension_numbers<[1], [0], [0], [1], [0, 0, 1, 1], [], []>} : vector<2x24xf32>, vector<24x16xf32>, vector<2x16xf32> -> vector<2x16xf32>
    %14 = vector.broadcast %8 : vector<1x16xf32> to vector<2x16xf32>
    %15 = arith.addf %13, %14 : vector<2x16xf32>
    %cst_19 = arith.constant 0.000000e+00 : f32
    %16 = vector.broadcast %cst_19 : f32 to vector<2x16xf32>
    %17 = arith.maximumf %15, %16 : vector<2x16xf32>
    %c32 = arith.constant 32 : index
    %c0_20 = arith.constant 0 : index
    %18 = vector.load %arg7[%c32, %c0_20] : memref<64x24xf32, #tpu.memory_space<vmem>>, vector<16x16xf32>
    %cst_21 = arith.constant dense<0.000000e+00> : vector<2x16xf32>
    %19 = tpu.matmul %17, %18, %cst_21 {dimension_numbers = #tpu.dot_dimension_numbers<[1], [0], [0], [1], [0, 0, 1, 1], [], []>} : vector<2x16xf32>, vector<16x16xf32>, vector<2x16xf32> -> vector<2x16xf32>
    %20 = vector.broadcast %9 : vector<1x16xf32> to vector<2x16xf32>
    %21 = arith.addf %19, %20 : vector<2x16xf32>
    %cst_22 = arith.constant 0.000000e+00 : f32
    %22 = vector.broadcast %cst_22 : f32 to vector<2x16xf32>
    %23 = arith.maximumf %21, %22 : vector<2x16xf32>
    %c48 = arith.constant 48 : index
    %c0_23 = arith.constant 0 : index
    %24 = vector.load %arg7[%c48, %c0_23] : memref<64x24xf32, #tpu.memory_space<vmem>>, vector<16x24xf32>
    %cst_24 = arith.constant dense<0.000000e+00> : vector<2x24xf32>
    %25 = tpu.matmul %23, %24, %cst_24 {dimension_numbers = #tpu.dot_dimension_numbers<[1], [0], [0], [1], [0, 0, 1, 1], [], []>} : vector<2x16xf32>, vector<16x24xf32>, vector<2x24xf32> -> vector<2x24xf32>
    %26 = vector.broadcast %10 : vector<1x24xf32> to vector<2x24xf32>
    %27 = arith.addf %25, %26 : vector<2x24xf32>
    %28 = vector.extract_strided_slice %11 {offsets = [0, 0], sizes = [1, 8], strides = [1, 1]} : vector<1x24xf32> to vector<1x8xf32>
    %29 = vector.extract_strided_slice %27 {offsets = [0, 0], sizes = [2, 8], strides = [1, 1]} : vector<2x24xf32> to vector<2x8xf32>
    %30 = math.tanh %29 : vector<2x8xf32>
    %31 = vector.broadcast %28 : vector<1x8xf32> to vector<2x8xf32>
    %32 = arith.mulf %31, %30 : vector<2x8xf32>
    %33 = vector.extract_strided_slice %27 {offsets = [0, 8], sizes = [2, 8], strides = [1, 1]} : vector<2x24xf32> to vector<2x8xf32>
    %34 = vector.extract_strided_slice %11 {offsets = [0, 16], sizes = [1, 8], strides = [1, 1]} : vector<1x24xf32> to vector<1x8xf32>
    %35 = vector.extract_strided_slice %27 {offsets = [0, 16], sizes = [2, 8], strides = [1, 1]} : vector<2x24xf32> to vector<2x8xf32>
    %36 = math.tanh %35 : vector<2x8xf32>
    %37 = vector.broadcast %34 : vector<1x8xf32> to vector<2x8xf32>
    %38 = arith.mulf %37, %36 : vector<2x8xf32>
    %cst_25 = arith.constant 5.000000e-01 : f32
    %39 = arith.mulf %cst_25, %0 : f32
    %40 = vector.broadcast %39 : f32 to vector<2x8xf32>
    %41 = arith.mulf %40, %32 : vector<2x8xf32>
    %42 = math.exp %41 : vector<2x8xf32>
    %43 = arith.mulf %2, %42 : vector<2x8xf32>
    %cst_26 = arith.constant 5.000000e-01 : f32
    %44 = arith.mulf %cst_26, %0 : f32
    %45 = vector.broadcast %0 : f32 to vector<2x8xf32>
    %46 = arith.mulf %45, %38 : vector<2x8xf32>
    %47 = math.exp %46 : vector<2x8xf32>
    %48 = arith.mulf %47, %3 : vector<2x8xf32>
    %49 = arith.addf %48, %33 : vector<2x8xf32>
    %50 = vector.broadcast %44 : f32 to vector<2x8xf32>
    %51 = arith.mulf %50, %49 : vector<2x8xf32>
    %52 = arith.subf %43, %51 : vector<2x8xf32>
    %53 = arith.mulf %5, %1 : vector<2x8xf32>
    %54 = tpu.concatenate %52, %53, %4 in 1 : vector<2x8xf32>, vector<2x8xf32>, vector<2x8xf32> -> vector<2x24xf32>
    %c24_27 = arith.constant 24 : index
    %c0_28 = arith.constant 0 : index
    %55 = vector.load %arg8[%c24_27, %c0_28] : memref<64x24xf32, #tpu.memory_space<vmem>>, vector<1x16xf32>
    %c25_29 = arith.constant 25 : index
    %c0_30 = arith.constant 0 : index
    %56 = vector.load %arg8[%c25_29, %c0_30] : memref<64x24xf32, #tpu.memory_space<vmem>>, vector<1x16xf32>
    %c26_31 = arith.constant 26 : index
    %c0_32 = arith.constant 0 : index
    %57 = vector.load %arg8[%c26_31, %c0_32] : memref<64x24xf32, #tpu.memory_space<vmem>>, vector<1x24xf32>
    %c27_33 = arith.constant 27 : index
    %c0_34 = arith.constant 0 : index
    %58 = vector.load %arg8[%c27_33, %c0_34] : memref<64x24xf32, #tpu.memory_space<vmem>>, vector<1x24xf32>
    %c0_35 = arith.constant 0 : index
    %c0_36 = arith.constant 0 : index
    %59 = vector.load %arg8[%c0_35, %c0_36] : memref<64x24xf32, #tpu.memory_space<vmem>>, vector<24x16xf32>
    %cst_37 = arith.constant dense<0.000000e+00> : vector<2x16xf32>
    %60 = tpu.matmul %54, %59, %cst_37 {dimension_numbers = #tpu.dot_dimension_numbers<[1], [0], [0], [1], [0, 0, 1, 1], [], []>} : vector<2x24xf32>, vector<24x16xf32>, vector<2x16xf32> -> vector<2x16xf32>
    %61 = vector.broadcast %55 : vector<1x16xf32> to vector<2x16xf32>
    %62 = arith.addf %60, %61 : vector<2x16xf32>
    %cst_38 = arith.constant 0.000000e+00 : f32
    %63 = vector.broadcast %cst_38 : f32 to vector<2x16xf32>
    %64 = arith.maximumf %62, %63 : vector<2x16xf32>
    %c32_39 = arith.constant 32 : index
    %c0_40 = arith.constant 0 : index
    %65 = vector.load %arg8[%c32_39, %c0_40] : memref<64x24xf32, #tpu.memory_space<vmem>>, vector<16x16xf32>
    %cst_41 = arith.constant dense<0.000000e+00> : vector<2x16xf32>
    %66 = tpu.matmul %64, %65, %cst_41 {dimension_numbers = #tpu.dot_dimension_numbers<[1], [0], [0], [1], [0, 0, 1, 1], [], []>} : vector<2x16xf32>, vector<16x16xf32>, vector<2x16xf32> -> vector<2x16xf32>
    %67 = vector.broadcast %56 : vector<1x16xf32> to vector<2x16xf32>
    %68 = arith.addf %66, %67 : vector<2x16xf32>
    %cst_42 = arith.constant 0.000000e+00 : f32
    %69 = vector.broadcast %cst_42 : f32 to vector<2x16xf32>
    %70 = arith.maximumf %68, %69 : vector<2x16xf32>
    %c48_43 = arith.constant 48 : index
    %c0_44 = arith.constant 0 : index
    %71 = vector.load %arg8[%c48_43, %c0_44] : memref<64x24xf32, #tpu.memory_space<vmem>>, vector<16x24xf32>
    %cst_45 = arith.constant dense<0.000000e+00> : vector<2x24xf32>
    %72 = tpu.matmul %70, %71, %cst_45 {dimension_numbers = #tpu.dot_dimension_numbers<[1], [0], [0], [1], [0, 0, 1, 1], [], []>} : vector<2x16xf32>, vector<16x24xf32>, vector<2x24xf32> -> vector<2x24xf32>
    %73 = vector.broadcast %57 : vector<1x24xf32> to vector<2x24xf32>
    %74 = arith.addf %72, %73 : vector<2x24xf32>
    %75 = vector.extract_strided_slice %58 {offsets = [0, 0], sizes = [1, 8], strides = [1, 1]} : vector<1x24xf32> to vector<1x8xf32>
    %76 = vector.extract_strided_slice %74 {offsets = [0, 0], sizes = [2, 8], strides = [1, 1]} : vector<2x24xf32> to vector<2x8xf32>
    %77 = math.tanh %76 : vector<2x8xf32>
    %78 = vector.broadcast %75 : vector<1x8xf32> to vector<2x8xf32>
    %79 = arith.mulf %78, %77 : vector<2x8xf32>
    %80 = vector.extract_strided_slice %74 {offsets = [0, 8], sizes = [2, 8], strides = [1, 1]} : vector<2x24xf32> to vector<2x8xf32>
    %81 = vector.extract_strided_slice %58 {offsets = [0, 16], sizes = [1, 8], strides = [1, 1]} : vector<1x24xf32> to vector<1x8xf32>
    %82 = vector.extract_strided_slice %74 {offsets = [0, 16], sizes = [2, 8], strides = [1, 1]} : vector<2x24xf32> to vector<2x8xf32>
    %83 = math.tanh %82 : vector<2x8xf32>
    %84 = vector.broadcast %81 : vector<1x8xf32> to vector<2x8xf32>
    %85 = arith.mulf %84, %83 : vector<2x8xf32>
    %86 = vector.broadcast %0 : f32 to vector<2x8xf32>
    %87 = arith.mulf %86, %79 : vector<2x8xf32>
    %88 = math.exp %87 : vector<2x8xf32>
    %89 = arith.mulf %1, %88 : vector<2x8xf32>
    %90 = vector.broadcast %0 : f32 to vector<2x8xf32>
    %91 = arith.mulf %90, %85 : vector<2x8xf32>
    %92 = math.exp %91 : vector<2x8xf32>
    %93 = arith.mulf %92, %52 : vector<2x8xf32>
    %94 = arith.addf %93, %80 : vector<2x8xf32>
    %95 = vector.broadcast %0 : f32 to vector<2x8xf32>
    %96 = arith.mulf %95, %94 : vector<2x8xf32>
    %97 = arith.addf %89, %96 : vector<2x8xf32>
    %98 = arith.mulf %6, %97 : vector<2x8xf32>
    %99 = arith.addf %53, %98 : vector<2x8xf32>
    %100 = arith.mulf %6, %99 : vector<2x8xf32>
    %101 = tpu.concatenate %52, %100, %4 in 1 : vector<2x8xf32>, vector<2x8xf32>, vector<2x8xf32> -> vector<2x24xf32>
    %c24_46 = arith.constant 24 : index
    %c0_47 = arith.constant 0 : index
    %102 = vector.load %arg8[%c24_46, %c0_47] : memref<64x24xf32, #tpu.memory_space<vmem>>, vector<1x16xf32>
    %c25_48 = arith.constant 25 : index
    %c0_49 = arith.constant 0 : index
    %103 = vector.load %arg8[%c25_48, %c0_49] : memref<64x24xf32, #tpu.memory_space<vmem>>, vector<1x16xf32>
    %c26_50 = arith.constant 26 : index
    %c0_51 = arith.constant 0 : index
    %104 = vector.load %arg8[%c26_50, %c0_51] : memref<64x24xf32, #tpu.memory_space<vmem>>, vector<1x24xf32>
    %c27_52 = arith.constant 27 : index
    %c0_53 = arith.constant 0 : index
    %105 = vector.load %arg8[%c27_52, %c0_53] : memref<64x24xf32, #tpu.memory_space<vmem>>, vector<1x24xf32>
    %c0_54 = arith.constant 0 : index
    %c0_55 = arith.constant 0 : index
    %106 = vector.load %arg8[%c0_54, %c0_55] : memref<64x24xf32, #tpu.memory_space<vmem>>, vector<24x16xf32>
    %cst_56 = arith.constant dense<0.000000e+00> : vector<2x16xf32>
    %107 = tpu.matmul %101, %106, %cst_56 {dimension_numbers = #tpu.dot_dimension_numbers<[1], [0], [0], [1], [0, 0, 1, 1], [], []>} : vector<2x24xf32>, vector<24x16xf32>, vector<2x16xf32> -> vector<2x16xf32>
    %108 = vector.broadcast %102 : vector<1x16xf32> to vector<2x16xf32>
    %109 = arith.addf %107, %108 : vector<2x16xf32>
    %cst_57 = arith.constant 0.000000e+00 : f32
    %110 = vector.broadcast %cst_57 : f32 to vector<2x16xf32>
    %111 = arith.maximumf %109, %110 : vector<2x16xf32>
    %c32_58 = arith.constant 32 : index
    %c0_59 = arith.constant 0 : index
    %112 = vector.load %arg8[%c32_58, %c0_59] : memref<64x24xf32, #tpu.memory_space<vmem>>, vector<16x16xf32>
    %cst_60 = arith.constant dense<0.000000e+00> : vector<2x16xf32>
    %113 = tpu.matmul %111, %112, %cst_60 {dimension_numbers = #tpu.dot_dimension_numbers<[1], [0], [0], [1], [0, 0, 1, 1], [], []>} : vector<2x16xf32>, vector<16x16xf32>, vector<2x16xf32> -> vector<2x16xf32>
    %114 = vector.broadcast %103 : vector<1x16xf32> to vector<2x16xf32>
    %115 = arith.addf %113, %114 : vector<2x16xf32>
    %cst_61 = arith.constant 0.000000e+00 : f32
    %116 = vector.broadcast %cst_61 : f32 to vector<2x16xf32>
    %117 = arith.maximumf %115, %116 : vector<2x16xf32>
    %c48_62 = arith.constant 48 : index
    %c0_63 = arith.constant 0 : index
    %118 = vector.load %arg8[%c48_62, %c0_63] : memref<64x24xf32, #tpu.memory_space<vmem>>, vector<16x24xf32>
    %cst_64 = arith.constant dense<0.000000e+00> : vector<2x24xf32>
    %119 = tpu.matmul %117, %118, %cst_64 {dimension_numbers = #tpu.dot_dimension_numbers<[1], [0], [0], [1], [0, 0, 1, 1], [], []>} : vector<2x16xf32>, vector<16x24xf32>, vector<2x24xf32> -> vector<2x24xf32>
    %120 = vector.broadcast %104 : vector<1x24xf32> to vector<2x24xf32>
    %121 = arith.addf %119, %120 : vector<2x24xf32>
    %122 = vector.extract_strided_slice %105 {offsets = [0, 0], sizes = [1, 8], strides = [1, 1]} : vector<1x24xf32> to vector<1x8xf32>
    %123 = vector.extract_strided_slice %121 {offsets = [0, 0], sizes = [2, 8], strides = [1, 1]} : vector<2x24xf32> to vector<2x8xf32>
    %124 = math.tanh %123 : vector<2x8xf32>
    %125 = vector.broadcast %122 : vector<1x8xf32> to vector<2x8xf32>
    %126 = arith.mulf %125, %124 : vector<2x8xf32>
    %127 = vector.extract_strided_slice %121 {offsets = [0, 8], sizes = [2, 8], strides = [1, 1]} : vector<2x24xf32> to vector<2x8xf32>
    %128 = vector.extract_strided_slice %105 {offsets = [0, 16], sizes = [1, 8], strides = [1, 1]} : vector<1x24xf32> to vector<1x8xf32>
    %129 = vector.extract_strided_slice %121 {offsets = [0, 16], sizes = [2, 8], strides = [1, 1]} : vector<2x24xf32> to vector<2x8xf32>
    %130 = math.tanh %129 : vector<2x8xf32>
    %131 = vector.broadcast %128 : vector<1x8xf32> to vector<2x8xf32>
    %132 = arith.mulf %131, %130 : vector<2x8xf32>
    %133 = vector.broadcast %0 : f32 to vector<2x8xf32>
    %134 = arith.mulf %133, %126 : vector<2x8xf32>
    %135 = math.exp %134 : vector<2x8xf32>
    %136 = arith.mulf %99, %135 : vector<2x8xf32>
    %137 = vector.broadcast %0 : f32 to vector<2x8xf32>
    %138 = arith.mulf %137, %132 : vector<2x8xf32>
    %139 = math.exp %138 : vector<2x8xf32>
    %140 = arith.mulf %139, %52 : vector<2x8xf32>
    %141 = arith.addf %140, %127 : vector<2x8xf32>
    %142 = vector.broadcast %0 : f32 to vector<2x8xf32>
    %143 = arith.mulf %142, %141 : vector<2x8xf32>
    %144 = arith.addf %136, %143 : vector<2x8xf32>
    %145 = arith.mulf %5, %144 : vector<2x8xf32>
    %146 = arith.addf %100, %145 : vector<2x8xf32>
    %c0_65 = arith.constant 0 : index
    %c0_66 = arith.constant 0 : index
    %147 = vector.load %arg9[%c0_65, %c0_66] : memref<2x8xf32, #tpu.memory_space<vmem>>, vector<2x8xf32>
    tpu.vector_store %arg9[%c0_65, %c0_66], %146 {strides = array<i32>} : memref<2x8xf32, #tpu.memory_space<vmem>>, vector<2x8xf32>,
    %c0_67 = arith.constant 0 : index
    %c0_68 = arith.constant 0 : index
    %148 = vector.load %arg10[%c0_67, %c0_68] : memref<2x8xf32, #tpu.memory_space<vmem>>, vector<2x8xf32>
    tpu.vector_store %arg10[%c0_67, %c0_68], %52 {strides = array<i32>} : memref<2x8xf32, #tpu.memory_space<vmem>>, vector<2x8xf32>,
    %149 = arith.mulf %6, %87 : vector<2x8xf32>
    %150 = arith.addf %41, %149 : vector<2x8xf32>
    %151 = arith.mulf %5, %134 : vector<2x8xf32>
    %152 = arith.addf %150, %151 : vector<2x8xf32>
    %cst_69 = arith.constant dense<0.000000e+00> : vector<2xf32>
    %153 = vector.multi_reduction <add>, %152, %cst_69 [1] : vector<2x8xf32> to vector<2xf32>
    %154 = vector.shape_cast %153 : vector<2xf32> to vector<2x1xf32>
    %155 = vector.shape_cast %154 : vector<2x1xf32> to vector<2x1xf32>
    %156 = vector.broadcast %155 : vector<2x1xf32> to vector<2x128xf32>
    %c0_70 = arith.constant 0 : index
    %c0_71 = arith.constant 0 : index
    %157 = vector.load %arg11[%c0_70, %c0_71] : memref<2x128xf32, #tpu.memory_space<vmem>>, vector<2x128xf32>
    tpu.vector_store %arg11[%c0_70, %c0_71], %156 {strides = array<i32>} : memref<2x128xf32, #tpu.memory_space<vmem>>, vector<2x128xf32>,
    return
  }
}

</mosaic_0001>

<bundles_post_ra>
// kernel: tpu_custom_call.1
= control target key start
LH: loop header
LB: loop body
LE: loop exit
PB: predicated region body
PF: predicated region fallthrough
CT: control target
= control target key end

     0   :  { %18 = vsyncpa [#allocation4], 0  ;;  %s1114_s19 = smov 8   ;;  %v1115_v3 = vmov 0.0   ;;  %vm1116_vm0 = vmmov 0   ;;  %s1402_s0 = inlined_call_operand.<no memory space> [shape: f32[1,1], index: 0, kind: input, shape index: {}]   ;;  %s1403_s1 = inlined_call_operand.vmem [shape: f32[2,8], index: 1, kind: input, shape index: {}]   ;;  %s1404_s2 = inlined_call_operand.vmem [shape: f32[2,8], index: 2, kind: input, shape index: {}]   ;;  %s1405_s3 = inlined_call_operand.vmem [shape: f32[2,8], index: 3, kind: input, shape index: {}]   ;;  %s1406_s4 = inlined_call_operand.vmem [shape: f32[2,8], index: 4, kind: input, shape index: {}]   ;;  %s1407_s5 = inlined_call_operand.vmem [shape: f32[2,8], index: 5, kind: input, shape index: {}]   ;;  %s1408_s6 = inlined_call_operand.vmem [shape: f32[2,8], index: 6, kind: input, shape index: {}]   ;;  %s1409_s7 = inlined_call_operand.vmem [shape: f32[64,24], index: 7, kind: input, shape index: {}]   ;;  %s1410_s8 = inlined_call_operand.vmem [shape: f32[64,24], index: 8, kind: input, shape index: {}]   ;;  %s1411_s9 = inlined_call_operand.hbm [shape: f32[2,8], index: 9, kind: output, shape index: {0}]   ;;  %s1412_s10 = inlined_call_operand.hbm [shape: f32[2,8], index: 10, kind: output, shape index: {1}]   ;;  %s1413_s11 = inlined_call_operand.hbm [shape: f32[2,128], index: 11, kind: output, shape index: {2}]  }
   0x1   :  { %v41_v0 = vld [vmem:[%s1405_s3] sm:$0x3]  ;;  %v63_v1 = vld [vmem:[%s1409_s7 + $0x10] sm:$0xff]  ;;  %959 = vmatprep.subr.mxu0 %v1115_v3  ;;  %v62_v4 = vld [vmem:[%s1409_s7 + $0x8] sm:$0xff]  ;;  %968 = vmatprep.subr.mxu1 %v1115_v3 }
   0x2   :  { %46 = vrot.lane.b32.xlu0 %v41_v0, %s1114_s19  ;;  %v42_v2 = vld [vmem:[%s1406_s4] sm:$0x3]  ;;  %960 = vmatpush3.msra.mxu0 %v63_v1 }
   0x3   :  { %965 = vmatprep.mubr.msk.f32.mxu0 %vm1116_vm0, %v1115_v3 }
   0x4   :  { %19 = vsyncpa [#allocation6], 0  ;;  %961 = vmatprep.subr.mxu0 %v1115_v3  ;;  %v61_v5 = vld [vmem:[%s1409_s7] sm:$0xff]  ;;  %972 = vmatprep.mubr.msk.f32.mxu1 %vm1116_vm0, %v1115_v3  ;;  %s1117_s4 = smov 16   ;;  %vm53_vm1 = vcmask 64512   ;;  %vm55_vm2 = vcmask 130048   ;;  %v1279_v35 = vstv %s1402_s0 }
   0x5   :  { %962 = vmatpush3.msra.mxu0 %v62_v4  ;;  %318 = vrot.lane.b32.xlu1 %v41_v0, %s1117_s4  ;;  %v1212_v7 = vld [vmem:[%s1403_s1] sm:$0x3]  ;;  %vm68_vm3 = vcmask 195584   ;;  %v144_v11 = vld [vmem:[%s1409_s7 + $0x28] sm:$0xff]  ;;  %v912_v13 = vld [vmem:[%s1409_s7 + $0x18] ss:$0 sm:$0xff] }
   0x6   :  { %50 = vrot.lane.b32.xlu0 %v42_v2, %s1117_s4  ;;  %963 = vmatprep.subr.mxu0 %v1115_v3  ;;  %v143_v12 = vld [vmem:[%s1409_s7 + $0x20] sm:$0xff]  ;;  %v224_v18 = vld [vmem:[%s1409_s7 + $0x38] sm:$0xff]  ;;  %v223_v19 = vld [vmem:[%s1409_s7 + $0x30] sm:$0xff]  ;;  %s308_s15 = smul.f32 0.5, %s1402_s0  ;;  %s1118_s16 = smov 112   ;;  %vm860_vm4 = vcmask 58368  }
   0x7   :  { %964 = vmatpush3.msra.mxu0 %v61_v5  ;;  %969 = vmatpush3.msra.mxu1 %v144_v11  ;;  %v914_v20 = vld [vmem:[%s1409_s7 + $0x19] ss:$0 sm:$0xff]  ;;  %v1254_v25 = vld [vmem:[%s1410_s8 + $0x10] sm:$0xff]  ;;  %v916_v26 = vld [vmem:[%s1409_s7 + $0x1a] ss:$0 sm:$0xff] }
   0x8   :  { %982 = vmatprep.subr.mxu0 %v1115_v3  ;;  %970 = vmatprep.subr.mxu1 %v1115_v3  ;;  %v1264_v28 = vld [vmem:[%s1407_s5] sm:$0x3]  ;;  %v918_v33 = vld [vmem:[%s1409_s7 + $0x1b] ss:$0 sm:$0xff]  ;;  %v345_v38 = vld [vmem:[%s1410_s8 + $0x8] sm:$0xff]  ;;  %v309_v45 = vstv %s308_s15 }
   0x9   :  { %971 = vmatpush3.msra.mxu1 %v143_v12  ;;  %v1269_v31 = vmul.f32 %v1264_v28, %v1212_v7  ;;  %v344_v39 = vld [vmem:[%s1410_s8] sm:$0xff]  ;;  %v426_v57 = vld [vmem:[%s1410_s8 + $0x28] sm:$0xff]  ;;  %v1324_v59 = vld [vmem:[%s1410_s8 + $0x18] ss:$0 sm:$0xff] }
   0xa   :  { %975 = vmatprep.subr.mxu1 %v1115_v3  ;;  %v40_v50 = vld [vmem:[%s1404_s2] sm:$0x3]  ;;  %v506_v0 = vld [vmem:[%s1410_s8 + $0x38] sm:$0xff]  ;;  %v505_v1 = vld [vmem:[%s1410_s8 + $0x30] sm:$0xff] }
   0xb   :  { %v425_v58 = vld [vmem:[%s1410_s8 + $0x20] sm:$0xff]  ;;  %v921_v2 = vld [vmem:[%s1410_s8 + $0x19] ss:$0 sm:$0xff] }
  0x74   :  { %v47_v6 = vpop.permute.xlu0 %46 }
  0x75   :  { %v54_v8 = vsel %vm53_vm1, %v1212_v7, %v47_v6 }
  0x77   :  { %v319_v41 = vpop.permute.xlu1 %318 }
  0x78   :  { %v1216_v9 = vpop.permute.xlu0 %50 }
  0x79   :  { %v56_v10 = vsel %vm55_vm2, %v54_v8, %v1216_v9 }
  0x7a   :  { %966 = vmatmul.mubr.msk.f32.vlgmr.msra.gmra.mxu0 %vm68_vm3, %v56_v10  ;;  %v923_v10 = vld [vmem:[%s1410_s8 + $0x1a] ss:$0 sm:$0xff] }
  0x7b   :  { %988 = vmatprep.mubr.msk.f32.mxu0 %vm1116_vm0, %v1115_v3  ;;  %983 = vmatpush3.msra.mxu0 %v1254_v25 }
  0x7c   :  { %984 = vmatprep.subr.mxu0 %v1115_v3 }
  0x7d   :  { %985 = vmatpush3.msra.mxu0 %v345_v38 }
  0x7e   :  { %986 = vmatprep.subr.mxu0 %v1115_v3 }
  0x7f   :  { %987 = vmatpush3.msra.mxu0 %v344_v39 }
  0x80   :  { %998 = vmatprep.subr.mxu0 %v1115_v3 }
 0x13a   :  { %v138_v14 = vpop.f32.mrf.mxu0 }
 0x13b   :  { %v139_v15 = vadd.f32 %v912_v13, %v138_v14 }
 0x13c   :  { %v967_v16 = vpop.f32.mrf.mxu0 }
 0x13d   :  { %v142_v17 = vmax.f32 %v139_v15, 0.0  ;;  %v925_v15 = vld [vmem:[%s1410_s8 + $0x1b] ss:$0 sm:$0xff] }
 0x13f   :  { %973 = vmatmul.mubr.msk.f32.vlgmr.msra.gmra.mxu1 %vm55_vm2, %v142_v17 }
 0x140   :  { %979 = vmatprep.mubr.msk.f32.mxu1 %vm1116_vm0, %v1115_v3  ;;  %976 = vmatpush3.msra.mxu1 %v224_v18 }
 0x141   :  { %977 = vmatprep.subr.mxu1 %v1115_v3 }
 0x142   :  { %978 = vmatpush3.msra.mxu1 %v223_v19 }
 0x143   :  { %991 = vmatprep.subr.mxu1 %v1115_v3 }
 0x1ff   :  { %v218_v21 = vpop.f32.mrf.mxu1 }
 0x200   :  { %v219_v22 = vadd.f32 %v914_v20, %v218_v21 }
 0x201   :  { %v974_v23 = vpop.f32.mrf.mxu1 }
 0x202   :  { %v222_v24 = vmax.f32 %v219_v22, 0.0 }
 0x204   :  { %980 = vmatmul.mubr.msk.f32.vlgmr.msra.gmra.mxu1 %vm55_vm2, %v222_v24 }
 0x205   :  { %995 = vmatprep.mubr.msk.f32.mxu1 %vm1116_vm0, %v1115_v3  ;;  %992 = vmatpush3.msra.mxu1 %v426_v57 }
 0x206   :  { %993 = vmatprep.subr.mxu1 %v1115_v3 }
 0x207   :  { %994 = vmatpush3.msra.mxu1 %v425_v58 }
 0x208   :  { %1005 = vmatprep.subr.mxu1 %v1115_v3 }
 0x2c4   :  { %v298_v27 = vpop.f32.mrf.mxu1 }
 0x2c5   :  { %v299_v29 = vadd.f32 %v916_v26, %v298_v27 }
 0x2c6   :  { %v981_v30 = vpop.f32.mrf.mxu1 }
 0x2c7   :  { %323 = vrot.lane.b32.xlu1 %v299_v29, %s1114_s19  ;;  %1036 = vtanh.f32 %v299_v29  ;;  %v44_v29 = vld [vmem:[%s1408_s6] sm:$0x3]  ;;  %s1119_s6 = smov [#allocation5]  }
 0x2c8   :  { %s887_s12 = sshll.u32 %s1119_s6, 4  ;;  %s888_s12 = int_to_ptr.vmem [resolvable:$true] %s887_s12 }
 0x2c9   :  { %p1055_p1 = scmp.lt.s32.totalorder %s888_s12, %s888_s12 }
 0x2cb   :  { %335 = vrot.lane.b32.xlu1 %v1269_v31, %s1114_s19 }
 0x2d4   :  { %v1037_v32 = vpop.eup %1036 }
 0x2d5   :  { %v307_v34 = vmul.f32 %v1037_v32, %v918_v33 }
 0x2d7   :  { %v315_v36 = vmul.f32 %v1279_v35, %v307_v34  ;;  %v1294_v47 = vmul.f32 %v309_v45, %v307_v34 }
 0x2d9   :  { %v316_v37 = vmul.f32 1.442695, %v315_v36  ;;  %v311_v48 = vmul.f32 1.442695, %v1294_v47 }
 0x2db   :  { %1038 = vpow2.f32 %v316_v37 }
 0x2dc   :  { %1040 = vpow2.f32 %v311_v48 }
 0x2e8   :  { %v1039_v40 = vpop.eup %1038 }
 0x2e9   :  { %v321_v42 = vmul.f32 %v1039_v40, %v319_v41  ;;  %v1041_v49 = vpop.eup %1040 }
 0x2ea   :  { %v313_v51 = vmul.f32 %v1041_v49, %v40_v50 }
 0x339   :  { %v324_v43 = vpop.permute.xlu1 %323 }
 0x33a   :  { %v326_v44 = vadd.f32 %v324_v43, %v321_v42 }
 0x33c   :  { %v327_v46 = vmul.f32 %v326_v44, %v309_v45 }
 0x33d   :  { %v336_v53 = vpop.permute.xlu1 %335 }
 0x33e   :  { %329 = vrot.lane.b32.xlu0 %v327_v46, %s1118_s16 }
 0x3b0   :  { %v330_v52 = vpop.permute.xlu0 %329 }
 0x3b1   :  { %v1300_v54 = vsub.f32 %v313_v51, %v330_v52 }
 0x3b3   :  { %v338_v55 = vsel %vm53_vm1, %v1300_v54, %v336_v53  ;;  %595 = vrot.lane.b32.xlu0 %v1300_v54, %s1117_s4  ;;  %862 = vst.msk [vmem:[#allocation5] sm:$0x3] %vm860_vm4, %v1300_v54 }
 0x3b4   :  { %v339_v56 = vsel %vm55_vm2, %v338_v55, %v1216_v9 }
 0x3b5   :  { %989 = vmatmul.mubr.msk.f32.vlgmr.msra.gmra.mxu0 %vm68_vm3, %v339_v56 }
 0x3b6   :  { %1002 = vmatprep.mubr.msk.f32.mxu0 %vm1116_vm0, %v1115_v3  ;;  %999 = vmatpush3.msra.mxu0 %v506_v0 }
 0x3b7   :  { %1000 = vmatprep.subr.mxu0 %v1115_v3 }
 0x3b8   :  { %1001 = vmatpush3.msra.mxu0 %v505_v1 }
 0x3b9   :  { %1014 = vmatprep.subr.mxu0 %v1115_v3 }
 0x425   :  { %v596_v20 = vpop.permute.xlu0 %595 }
 0x475   :  { %v420_v60 = vpop.f32.mrf.mxu0 }
 0x476   :  { %v421_v61 = vadd.f32 %v1324_v59, %v420_v60 }
 0x477   :  { %v990_v62 = vpop.f32.mrf.mxu0 }
 0x478   :  { %v424_v63 = vmax.f32 %v421_v61, 0.0 }
 0x47a   :  { %996 = vmatmul.mubr.msk.f32.vlgmr.msra.gmra.mxu1 %vm55_vm2, %v424_v63 }
 0x47b   :  { %1006 = vmatpush3.msra.mxu1 %v1254_v25  ;;  %1011 = vmatprep.mubr.msk.f32.mxu1 %vm1116_vm0, %v1115_v3 }
 0x47c   :  { %1007 = vmatprep.subr.mxu1 %v1115_v3 }
 0x47d   :  { %1008 = vmatpush3.msra.mxu1 %v345_v38 }
 0x47e   :  { %1009 = vmatprep.subr.mxu1 %v1115_v3 }
 0x47f   :  { %1010 = vmatpush3.msra.mxu1 %v344_v39 }
 0x480   :  { %1021 = vmatprep.subr.mxu1 %v1115_v3 }
 0x53a   :  { %v500_v4 = vpop.f32.mrf.mxu1 }
 0x53b   :  { %v501_v5 = vadd.f32 %v921_v2, %v500_v4 }
 0x53c   :  { %v997_v6 = vpop.f32.mrf.mxu1 }
 0x53d   :  { %v504_v8 = vmax.f32 %v501_v5, 0.0 }
 0x53f   :  { %1003 = vmatmul.mubr.msk.f32.vlgmr.msra.gmra.mxu0 %vm55_vm2, %v504_v8 }
 0x540   :  { %1015 = vmatpush3.msra.mxu0 %v426_v57  ;;  %1018 = vmatprep.mubr.msk.f32.mxu0 %vm1116_vm0, %v1115_v3 }
 0x541   :  { %1016 = vmatprep.subr.mxu0 %v1115_v3 }
 0x542   :  { %1017 = vmatpush3.msra.mxu0 %v425_v58 }
 0x5ff   :  { %v580_v11 = vpop.f32.mrf.mxu0 }
 0x600   :  { %v581_v12 = vadd.f32 %v923_v10, %v580_v11 }
 0x601   :  { %v1004_v13 = vpop.f32.mrf.mxu0 }
 0x602   :  { %600 = vrot.lane.b32.xlu1 %v581_v12, %s1114_s19  ;;  %1042 = vtanh.f32 %v581_v12 }
 0x60f   :  { %v1043_v14 = vpop.eup %1042 }
 0x610   :  { %v589_v16 = vmul.f32 %v1043_v14, %v925_v15 }
 0x612   :  { %v590_v17 = vmul.f32 %v589_v16, %v1279_v35 }
 0x614   :  { %v591_v18 = vmul.f32 1.442695, %v590_v17  ;;  %v863_v48 = vmul.f32 %v590_v17, %v44_v29 }
 0x616   :  { %1044 = vpow2.f32 %v591_v18  ;;  %v864_v50 = vadd.f32 %v863_v48, %v1294_v47 }
 0x623   :  { %v1045_v19 = vpop.eup %1044 }
 0x624   :  { %v598_v21 = vmul.f32 %v1045_v19, %v596_v20  ;;  %v593_v25 = vmul.f32 %v1045_v19, %v1212_v7 }
 0x674   :  { %v601_v22 = vpop.permute.xlu1 %600 }
 0x675   :  { %v603_v23 = vadd.f32 %v601_v22, %v598_v21 }
 0x677   :  { %v604_v24 = vmul.f32 %v603_v23, %v1279_v35 }
 0x679   :  { %606 = vrot.lane.b32.xlu0 %v604_v24, %s1118_s16 }
 0x6eb   :  { %v607_v26 = vpop.permute.xlu0 %606 }
 0x6ec   :  { %v609_v27 = vadd.f32 %v607_v26, %v593_v25 }
 0x6ee   :  { %v610_v30 = vmul.f32 %v609_v27, %v44_v29 }
 0x6f0   :  { %v1364_v32 = vadd.f32 %v610_v30, %v1269_v31 }
 0x6f2   :  { %v1367_v33 = vmul.f32 %v1364_v32, %v44_v29 }
 0x6f4   :  { %614 = vrot.lane.b32.xlu1 %v1367_v33, %s1114_s19 }
 0x766   :  { %v615_v34 = vpop.permute.xlu1 %614 }
 0x767   :  { %v617_v7 = vsel %vm53_vm1, %v1300_v54, %v615_v34 }
 0x768   :  { %v618_v36 = vsel %vm55_vm2, %v617_v7, %v1216_v9 }
 0x769   :  { %1012 = vmatmul.mubr.msk.f32.vlgmr.msra.gmra.mxu1 %vm68_vm3, %v618_v36 }
 0x76a   :  { %1022 = vmatpush3.msra.mxu1 %v506_v0  ;;  %1025 = vmatprep.mubr.msk.f32.mxu1 %vm1116_vm0, %v1115_v3 }
 0x76b   :  { %1023 = vmatprep.subr.mxu1 %v1115_v3 }
 0x76c   :  { %1024 = vmatpush3.msra.mxu1 %v505_v1 }
 0x829   :  { %v688_v31 = vpop.f32.mrf.mxu1 }
 0x82a   :  { %v689_v37 = vadd.f32 %v1324_v59, %v688_v31 }
 0x82b   :  { %v1013_v38 = vpop.f32.mrf.mxu1 }
 0x82c   :  { %v692_v39 = vmax.f32 %v689_v37, 0.0 }
 0x82e   :  { %1019 = vmatmul.mubr.msk.f32.vlgmr.msra.gmra.mxu0 %vm55_vm2, %v692_v39 }
 0x8ee   :  { %v762_v40 = vpop.f32.mrf.mxu0 }
 0x8ef   :  { %v763_v41 = vadd.f32 %v921_v2, %v762_v40 }
 0x8f0   :  { %v1020_v42 = vpop.f32.mrf.mxu0 }
 0x8f1   :  { %v766_v9 = vmax.f32 %v763_v41, 0.0 }
 0x8f3   :  { %1026 = vmatmul.mubr.msk.f32.vlgmr.msra.gmra.mxu1 %vm55_vm2, %v766_v9 }
 0x9b3   :  { %v836_v43 = vpop.f32.mrf.mxu1 }
 0x9b4   :  { %v837_v44 = vadd.f32 %v923_v10, %v836_v43 }
 0x9b5   :  { %v1027_v45 = vpop.f32.mrf.mxu1 }
 0x9b6   :  { %1046 = vtanh.f32 %v837_v44  ;;  %848 = vrot.lane.b32.xlu0 %v837_v44, %s1114_s19  ;;  %s1050_s19 = scalar_lea.vmem %s888_s12, 32 }
 0x9b7   :  { %p1051_p0 = scmp.ne.s32.totalorder %s888_s12, %s1050_s19  ;;  %p1056_p2 = scmp.lt.s32.totalorder %s1050_s19, %s1050_s19 }
 0x9b9   :  { %p1057_p3 = por %p1056_p2, %p1055_p1 }
 0x9bb   :  { %p1058_p4 = pnand %p1057_p3, %p1051_p0 }
 0x9c3   :  { %v1047_v3 = vpop.eup %1046 }
 0x9c4   :  { %v841_v46 = vmul.f32 %v1047_v3, %v925_v15 }
 0x9c6   :  { %v842_v49 = vmul.f32 %v841_v46, %v1279_v35 }
 0x9c8   :  { %v865_v51 = vmul.f32 %v842_v49, %v1264_v28  ;;  %v843_v54 = vmul.f32 1.442695, %v842_v49 }
 0x9ca   :  { %v866_v52 = vadd.f32 %v865_v51, %v864_v50  ;;  %1048 = vpow2.f32 %v843_v54 }
 0x9cc   :  { %v867_v53 = vsel %vm860_vm4, %v866_v52, 0.0 }
 0x9cd   :  { %868 = vadd.xlane.f32.xlu1 %v867_v53 }
 0x9d7   :  { %v1049_v55 = vpop.eup %1048 }
 0x9d8   :  { %1061 = shalt.err (!%p1058_p4)
}
 0x9d9   :  { %890 = dma.vmem_to_hbm [thread:$0]  %s888_s12, 32, %s1412_s10, [#allocation6]   ;;  %v846_v47 = vmul.f32 %v1049_v55, %v596_v20 }
 0x9da   :  { %s1120_s14 = smov [#allocation7]  }
 0x9db   :  { %s897_s15 = sshll.u32 %s1120_s14, 4  ;;  %s898_s15 = int_to_ptr.vmem [resolvable:$true] %s897_s15 }
 0x9dc   :  { %s1070_s17 = scalar_lea.vmem %s898_s15, 32  ;;  %p1075_p6 = scmp.lt.s32.totalorder %s898_s15, %s898_s15 }
 0x9dd   :  { %p1071_p5 = scmp.ne.s32.totalorder %s898_s15, %s1070_s17  ;;  %p1076_p7 = scmp.lt.s32.totalorder %s1070_s17, %s1070_s17 }
 0x9df   :  { %p1077_p8 = por %p1076_p7, %p1075_p6 }
 0x9e1   :  { %p1078_p9 = pnand %p1077_p8, %p1071_p5 }
 0xa28   :  { %v849_v56 = vpop.permute.xlu0 %848 }
 0xa29   :  { %v851_v57 = vadd.f32 %v849_v56, %v846_v47 }
 0xa2b   :  { %v852_v58 = vmul.f32 %v851_v57, %v1279_v35 }
 0xa2d   :  { %854 = vrot.lane.b32.xlu0 %v852_v58, %s1118_s16 }
 0xa56   :  { %v869_v59 = vpop.xlane.xlu1 %868 }
 0xa57   :  { %870 = vst [vmem:[#allocation7] sm:$0x3] %v869_v59 }
 0xa58   :  { %1081 = shalt.err (!%p1078_p9)
}
 0xa59   :  { %900 = dma.vmem_to_hbm [thread:$0]  %s898_s15, 32, %s1413_s11, [#allocation6]   ;;  %v845_v35 = vmul.f32 %v1049_v55, %v1364_v32 }
 0xa5a   :  { %s1121_s16 = smov [#allocation3]  }
 0xa5b   :  { %s877_s0 = sshll.u32 %s1121_s16, 4  ;;  %s878_s0 = int_to_ptr.vmem [resolvable:$true] %s877_s0 }
 0xa5c   :  { %s1090_s2 = scalar_lea.vmem %s878_s0, 32  ;;  %p1095_p11 = scmp.lt.s32.totalorder %s878_s0, %s878_s0 }
 0xa5d   :  { %p1091_p10 = scmp.ne.s32.totalorder %s878_s0, %s1090_s2  ;;  %p1096_p12 = scmp.lt.s32.totalorder %s1090_s2, %s1090_s2 }
 0xa5f   :  { %p1097_p13 = por %p1096_p12, %p1095_p11 }
 0xa61   :  { %p1098_p0 = pnand %p1097_p13, %p1091_p10 }
 0xa9f   :  { %v855_v60 = vpop.permute.xlu0 %854 }
 0xaa0   :  { %v857_v61 = vadd.f32 %v855_v60, %v845_v35 }
 0xaa2   :  { %v858_v62 = vmul.f32 %v857_v61, %v1264_v28 }
 0xaa4   :  { %v859_v63 = vadd.f32 %v858_v62, %v1367_v33 }
 0xaa6   :  { %861 = vst.msk [vmem:[#allocation3] sm:$0x3] %vm860_vm4, %v859_v63 }
 0xaa7   :  { %1101 = shalt.err (!%p1098_p0)
}
 0xaa8   :  { %880 = dma.vmem_to_hbm [thread:$0]  %s878_s0, 32, %s1411_s9, [#allocation4]  }
 0xaa9   :  { %1110 = dma.done.wait [#allocation4], 32  }
 0xaaa   :  { %1111 = vsyncadd [#allocation4], 4294967264 }
 0xaab   :  { %1112 = dma.done.wait [#allocation6], 64  }
 0xaac   :  { %1113 = vsyncadd [#allocation6], 4294967232 }
 0xaad   :  { %910 = vsyncpa [#allocation4], 1 }
 0xaae   :  { %911 = vsyncpa [#allocation6], 1 }

</bundles_post_ra>
